<compile_context>
chip_gen: v5e
topology: v5e:2x2
jax: 0.10.0
libtpu: 0.0.40
codegen_flags: <defaults>
</compile_context>

<pallas_src>
import functools

import jax
import jax.numpy as jnp
from jax.experimental import pallas as pl
from jax.experimental.pallas import tpu as pltpu


def _round_up(x, mult):
    return ((x + mult - 1) // mult) * mult


def _vmem_capacity_bytes():
    try:
        return int(pltpu.get_tpu_info().vmem_capacity_bytes)
    except Exception:
        return 64 * 1024 * 1024  # conservative: v7x per-TensorCore VMEM


def _netg_kernel(x_ref, z_ref, m_ref,
                 w1a_ref, w1b_ref, b1_ref,
                 w2_ref, b2_ref,
                 w3_ref, b3_ref,
                 o_ref):
    x = x_ref[...]
    z = z_ref[...]
    m = m_ref[...]

    # inp = m*x + (1-m)*z  ==  z + m*(x - z)   (elementwise mix on the VPU, f32)
    inp = z + m * (x - z)

    # fc1 on cat([inp, m], dim=1) == inp @ W1_top + m @ W1_bot  (bf16 MXU, f32 acc)
    h1 = (jnp.dot(inp.astype(jnp.bfloat16), w1a_ref[...],
                  preferred_element_type=jnp.float32)
          + jnp.dot(m.astype(jnp.bfloat16), w1b_ref[...],
                    preferred_element_type=jnp.float32)
          + b1_ref[...])
    h1 = jnp.maximum(h1, 0.0)

    # fc2 + relu
    h2 = (jnp.dot(h1.astype(jnp.bfloat16), w2_ref[...],
                  preferred_element_type=jnp.float32) + b2_ref[...])
    h2 = jnp.maximum(h2, 0.0)

    # fc3 + sigmoid
    logits = (jnp.dot(h2.astype(jnp.bfloat16), w3_ref[...],
                      preferred_element_type=jnp.float32) + b3_ref[...])
    o_ref[...] = jax.nn.sigmoid(logits).astype(o_ref.dtype)


def prepare_netg_params(params):
    """One-time weight prep (hoisted out of the hot path).

    Splits W1 so the concat folds into two dots, casts weights to bf16 for the
    MXU, keeps biases in f32 row vectors.
    """
    f32, bf16 = jnp.float32, jnp.bfloat16
    F = params["w3"].shape[1]
    w1 = params["w1"]
    return {
        "w1a": w1[:F, :].astype(bf16),                   # (F, 256)  inp branch
        "w1b": w1[F:, :].astype(bf16),                   # (F, 256)  mask branch
        "b1": params["b1"].reshape(1, -1).astype(f32),   # (1, 256)
        "w2": params["w2"].astype(bf16),                 # (256, 128)
        "b2": params["b2"].reshape(1, -1).astype(f32),   # (1, 128)
        "w3": params["w3"].astype(bf16),                 # (128, F)
        "b3": params["b3"].reshape(1, -1).astype(f32),   # (1, F)
    }


def _choose_block_b(B, F, block_b):
    """VMEM-aware batch-tile sizing (trace-time Python, static shapes)."""
    f_lanes = max(128, _round_up(F, 128))        # last dim pads to 128 lanes in VMEM
    per_row_bytes = 44 * f_lanes + 4096          # 2-buffered data tiles + intermediates
    vmem_cap = _vmem_capacity_bytes()
    budget = int(0.4 * vmem_cap)
    cap_rows = max(8, budget // per_row_bytes)
    if block_b is None:
        block_b = min(2048, cap_rows, _round_up(B, 8))
        if B > 8:
            # keep >= 2 grid steps so v7x's two TensorCores both get work
            block_b = min(block_b, max(8, _round_up(pl.cdiv(B, 2), 8)))
    else:
        block_b = min(block_b, cap_rows)          # clamp user value to VMEM budget
    block_b = max(8, (block_b // 8) * 8)
    vmem_limit = max(32 * 1024 * 1024, int(0.5 * vmem_cap))
    return block_b, vmem_limit


@functools.partial(jax.jit, static_argnames=("block_b",))
def netg_forward(x, z, m, prepared, *, block_b=None):
    """Run the NetG generator forward pass with a Pallas TPU kernel.

    x, z, m:  (B, F) float32 (unpadded, streamed directly).
    prepared: output of prepare_netg_params().
    """
    B, F = x.shape
    f32 = jnp.float32
    x = x.astype(f32)
    z = z.astype(f32)
    m = m.astype(f32)

    block_b, vmem_limit = _choose_block_b(B, F, block_b)
    grid = (pl.cdiv(B, block_b),)

    data_spec = pl.BlockSpec((block_b, F), lambda i: (i, 0))
    full2d = lambda a: pl.BlockSpec(a.shape, lambda i: (0, 0))

    w1a, w1b = prepared["w1a"], prepared["w1b"]
    b1, w2, b2 = prepared["b1"], prepared["w2"], prepared["b2"]
    w3, b3 = prepared["w3"], prepared["b3"]

    return pl.pallas_call(
        _netg_kernel,
        out_shape=jax.ShapeDtypeStruct((B, F), f32),
        grid_spec=pltpu.PrefetchScalarGridSpec(
            num_scalar_prefetch=0,
            grid=grid,
            in_specs=[
                data_spec, data_spec, data_spec,          # x, z, m (full-F blocks)
                full2d(w1a), full2d(w1b), full2d(b1),
                full2d(w2), full2d(b2),
                full2d(w3), full2d(b3),
            ],
            out_specs=pl.BlockSpec((block_b, F), lambda i: (i, 0)),
        ),
        compiler_params=pltpu.CompilerParams(
            dimension_semantics=("parallel",),
            vmem_limit_bytes=vmem_limit,
        ),
    )(x, z, m, w1a, w1b, b1, w2, b2, w3, b3)


def init_netg_params(key, feature_dim):
    """Deterministic parameter init matching the module's shapes.

    Weights: xavier-normal (as in the module's init_weight()), stored (in, out).
    Biases: uniform(-1/sqrt(fan_in), 1/sqrt(fan_in)) (PyTorch Linear default).
    """
    def xavier_normal(k, fan_in, fan_out):
        std = jnp.sqrt(2.0 / (fan_in + fan_out))
        return std * jax.random.normal(k, (fan_in, fan_out), dtype=jnp.float32)

    def bias_uniform(k, fan_in, fan_out):
        bound = 1.0 / jnp.sqrt(jnp.asarray(fan_in, jnp.float32))
        return jax.random.uniform(k, (fan_out,), minval=-bound, maxval=bound,
                                  dtype=jnp.float32)

    k1, k2, k3, k4, k5, k6 = jax.random.split(key, 6)
    F = feature_dim
    return {
        "w1": xavier_normal(k1, 2 * F, 256), "b1": bias_uniform(k4, 2 * F, 256),
        "w2": xavier_normal(k2, 256, 128),   "b2": bias_uniform(k5, 256, 128),
        "w3": xavier_normal(k3, 128, F),     "b3": bias_uniform(k6, 128, F),
    }


def netg_reference(x, z, m, params):
    """Pure-JAX f32 reference for correctness checking."""
    inp = m * x + (1.0 - m) * z
    h = jnp.concatenate([inp, m], axis=1)
    h1 = jax.nn.relu(h @ params["w1"] + params["b1"])
    h2 = jax.nn.relu(h1 @ params["w2"] + params["b2"])
    return jax.nn.sigmoid(h2 @ params["w3"] + params["b3"])


if __name__ == "__main__":
    key = jax.random.PRNGKey(0)
    kp, kx, kz, km = jax.random.split(key, 4)

    batch = 64
    feature_dim = 16

    params = init_netg_params(kp, feature_dim)
    prepared = prepare_netg_params(params)      # one-time weight prep

    x = jax.random.normal(kx, (batch, feature_dim), dtype=jnp.float32)
    z = jax.random.uniform(kz, (batch, feature_dim), dtype=jnp.float32)
    m = (jax.random.uniform(km, (batch, feature_dim)) > 0.5).astype(jnp.float32)

    out = netg_forward(x, z, m, prepared)
    out = jax.block_until_ready(out)

    ref = netg_reference(x, z, m, params)
    assert out.shape == (batch, feature_dim)
    # bf16 matmuls with f32 accumulation: loosened tolerance vs. the f32 reference.
    assert jnp.allclose(out, ref, atol=2e-2, rtol=0.0), "mismatch vs reference"

    print("KERNEL_OK")
</pallas_src>

<mosaic_0001>
module attributes {stable_mosaic.version = 11 : i64} {
  func.func @_netg_kernel(%arg0: i32, %arg1: memref<32x16xf32, #tpu.memory_space<vmem>>, %arg2: memref<32x16xf32, #tpu.memory_space<vmem>>, %arg3: memref<32x16xf32, #tpu.memory_space<vmem>>, %arg4: memref<16x256xbf16, #tpu.memory_space<vmem>>, %arg5: memref<16x256xbf16, #tpu.memory_space<vmem>>, %arg6: memref<1x256xf32, #tpu.memory_space<vmem>>, %arg7: memref<256x128xbf16, #tpu.memory_space<vmem>>, %arg8: memref<1x128xf32, #tpu.memory_space<vmem>>, %arg9: memref<128x16xbf16, #tpu.memory_space<vmem>>, %arg10: memref<1x16xf32, #tpu.memory_space<vmem>>, %arg11: memref<32x16xf32, #tpu.memory_space<vmem>>) attributes {dimension_semantics = [#tpu.dimension_semantics<parallel>], iteration_bounds = array<i64: 2>, scalar_prefetch = 0 : i64, scratch_operands = 0 : i64, tpu.core_type = #tpu.core_type<tc>, window_params = [{transform_indices = @transform_0, window_bounds = array<i64: 32, 16>}, {transform_indices = @transform_1, window_bounds = array<i64: 32, 16>}, {transform_indices = @transform_2, window_bounds = array<i64: 32, 16>}, {pipeline_mode = #tpu.pipeline_mode<synchronous>, transform_indices = @transform_3, window_bounds = array<i64: 16, 256>}, {pipeline_mode = #tpu.pipeline_mode<synchronous>, transform_indices = @transform_4, window_bounds = array<i64: 16, 256>}, {pipeline_mode = #tpu.pipeline_mode<synchronous>, transform_indices = @transform_5, window_bounds = array<i64: 1, 256>}, {pipeline_mode = #tpu.pipeline_mode<synchronous>, transform_indices = @transform_6, window_bounds = array<i64: 256, 128>}, {pipeline_mode = #tpu.pipeline_mode<synchronous>, transform_indices = @transform_7, window_bounds = array<i64: 1, 128>}, {pipeline_mode = #tpu.pipeline_mode<synchronous>, transform_indices = @transform_8, window_bounds = array<i64: 128, 16>}, {pipeline_mode = #tpu.pipeline_mode<synchronous>, transform_indices = @transform_9, window_bounds = array<i64: 1, 16>}, {transform_indices = @transform_10, window_bounds = array<i64: 32, 16>}]} {
    %c0 = arith.constant 0 : index
    %c0_0 = arith.constant 0 : index
    %0 = vector.load %arg1[%c0, %c0_0] : memref<32x16xf32, #tpu.memory_space<vmem>>, vector<32x16xf32>
    %c0_1 = arith.constant 0 : index
    %c0_2 = arith.constant 0 : index
    %1 = vector.load %arg2[%c0_1, %c0_2] : memref<32x16xf32, #tpu.memory_space<vmem>>, vector<32x16xf32>
    %c0_3 = arith.constant 0 : index
    %c0_4 = arith.constant 0 : index
    %2 = vector.load %arg3[%c0_3, %c0_4] : memref<32x16xf32, #tpu.memory_space<vmem>>, vector<32x16xf32>
    %3 = arith.subf %0, %1 : vector<32x16xf32>
    %4 = arith.mulf %2, %3 : vector<32x16xf32>
    %5 = arith.addf %1, %4 : vector<32x16xf32>
    %6 = arith.truncf %5 : vector<32x16xf32> to vector<32x16xbf16>
    %c0_5 = arith.constant 0 : index
    %c0_6 = arith.constant 0 : index
    %7 = vector.load %arg4[%c0_5, %c0_6] : memref<16x256xbf16, #tpu.memory_space<vmem>>, vector<16x256xbf16>
    %cst = arith.constant dense<0.000000e+00> : vector<32x256xf32>
    %8 = tpu.matmul %6, %7, %cst {dimension_numbers = #tpu.dot_dimension_numbers<[1], [0], [0], [1], [0, 0, 1, 1], [], []>} : vector<32x16xbf16>, vector<16x256xbf16>, vector<32x256xf32> -> vector<32x256xf32>
    %9 = arith.truncf %2 : vector<32x16xf32> to vector<32x16xbf16>
    %c0_7 = arith.constant 0 : index
    %c0_8 = arith.constant 0 : index
    %10 = vector.load %arg5[%c0_7, %c0_8] : memref<16x256xbf16, #tpu.memory_space<vmem>>, vector<16x256xbf16>
    %cst_9 = arith.constant dense<0.000000e+00> : vector<32x256xf32>
    %11 = tpu.matmul %9, %10, %cst_9 {dimension_numbers = #tpu.dot_dimension_numbers<[1], [0], [0], [1], [0, 0, 1, 1], [], []>} : vector<32x16xbf16>, vector<16x256xbf16>, vector<32x256xf32> -> vector<32x256xf32>
    %12 = arith.addf %8, %11 : vector<32x256xf32>
    %c0_10 = arith.constant 0 : index
    %c0_11 = arith.constant 0 : index
    %13 = vector.load %arg6[%c0_10, %c0_11] : memref<1x256xf32, #tpu.memory_space<vmem>>, vector<1x256xf32>
    %14 = vector.broadcast %13 : vector<1x256xf32> to vector<32x256xf32>
    %15 = arith.addf %12, %14 : vector<32x256xf32>
    %cst_12 = arith.constant 0.000000e+00 : f32
    %16 = vector.broadcast %cst_12 : f32 to vector<32x256xf32>
    %17 = arith.maximumf %15, %16 : vector<32x256xf32>
    %18 = arith.truncf %17 : vector<32x256xf32> to vector<32x256xbf16>
    %c0_13 = arith.constant 0 : index
    %c0_14 = arith.constant 0 : index
    %19 = vector.load %arg7[%c0_13, %c0_14] : memref<256x128xbf16, #tpu.memory_space<vmem>>, vector<256x128xbf16>
    %cst_15 = arith.constant dense<0.000000e+00> : vector<32x128xf32>
    %20 = tpu.matmul %18, %19, %cst_15 {dimension_numbers = #tpu.dot_dimension_numbers<[1], [0], [0], [1], [0, 0, 1, 1], [], []>} : vector<32x256xbf16>, vector<256x128xbf16>, vector<32x128xf32> -> vector<32x128xf32>
    %c0_16 = arith.constant 0 : index
    %c0_17 = arith.constant 0 : index
    %21 = vector.load %arg8[%c0_16, %c0_17] : memref<1x128xf32, #tpu.memory_space<vmem>>, vector<1x128xf32>
    %22 = vector.broadcast %21 : vector<1x128xf32> to vector<32x128xf32>
    %23 = arith.addf %20, %22 : vector<32x128xf32>
    %cst_18 = arith.constant 0.000000e+00 : f32
    %24 = vector.broadcast %cst_18 : f32 to vector<32x128xf32>
    %25 = arith.maximumf %23, %24 : vector<32x128xf32>
    %26 = arith.truncf %25 : vector<32x128xf32> to vector<32x128xbf16>
    %c0_19 = arith.constant 0 : index
    %c0_20 = arith.constant 0 : index
    %27 = vector.load %arg9[%c0_19, %c0_20] : memref<128x16xbf16, #tpu.memory_space<vmem>>, vector<128x16xbf16>
    %cst_21 = arith.constant dense<0.000000e+00> : vector<32x16xf32>
    %28 = tpu.matmul %26, %27, %cst_21 {dimension_numbers = #tpu.dot_dimension_numbers<[1], [0], [0], [1], [0, 0, 1, 1], [], []>} : vector<32x128xbf16>, vector<128x16xbf16>, vector<32x16xf32> -> vector<32x16xf32>
    %c0_22 = arith.constant 0 : index
    %c0_23 = arith.constant 0 : index
    %29 = vector.load %arg10[%c0_22, %c0_23] : memref<1x16xf32, #tpu.memory_space<vmem>>, vector<1x16xf32>
    %30 = vector.broadcast %29 : vector<1x16xf32> to vector<32x16xf32>
    %31 = arith.addf %28, %30 : vector<32x16xf32>
    %32 = arith.negf %31 : vector<32x16xf32>
    %33 = math.exp %32 : vector<32x16xf32>
    %cst_24 = arith.constant 1.000000e+00 : f32
    %34 = vector.broadcast %cst_24 : f32 to vector<32x16xf32>
    %35 = arith.addf %34, %33 : vector<32x16xf32>
    %36 = arith.divf %34, %35 : vector<32x16xf32>
    %c0_25 = arith.constant 0 : index
    %c0_26 = arith.constant 0 : index
    %37 = vector.load %arg11[%c0_25, %c0_26] : memref<32x16xf32, #tpu.memory_space<vmem>>, vector<32x16xf32>
    tpu.vector_store %arg11[%c0_25, %c0_26], %36 {strides = array<i32>} : memref<32x16xf32, #tpu.memory_space<vmem>>, vector<32x16xf32>,
    return
  }
  func.func @transform_0(%arg0: i32) -> (i32, i32) {
    %c0_i32 = arith.constant 0 : i32
    %c0_i32_0 = arith.constant 0 : i32
    return %arg0, %c0_i32 : i32, i32
  }
  func.func @transform_1(%arg0: i32) -> (i32, i32) {
    %c0_i32 = arith.constant 0 : i32
    %c0_i32_0 = arith.constant 0 : i32
    return %arg0, %c0_i32 : i32, i32
  }
  func.func @transform_2(%arg0: i32) -> (i32, i32) {
    %c0_i32 = arith.constant 0 : i32
    %c0_i32_0 = arith.constant 0 : i32
    return %arg0, %c0_i32 : i32, i32
  }
  func.func @transform_3(%arg0: i32) -> (i32, i32) {
    %c0_i32 = arith.constant 0 : i32
    %c0_i32_0 = arith.constant 0 : i32
    %c0_i32_1 = arith.constant 0 : i32
    return %c0_i32, %c0_i32_0 : i32, i32
  }
  func.func @transform_4(%arg0: i32) -> (i32, i32) {
    %c0_i32 = arith.constant 0 : i32
    %c0_i32_0 = arith.constant 0 : i32
    %c0_i32_1 = arith.constant 0 : i32
    return %c0_i32, %c0_i32_0 : i32, i32
  }
  func.func @transform_5(%arg0: i32) -> (i32, i32) {
    %c0_i32 = arith.constant 0 : i32
    %c0_i32_0 = arith.constant 0 : i32
    %c0_i32_1 = arith.constant 0 : i32
    return %c0_i32, %c0_i32_0 : i32, i32
  }
  func.func @transform_6(%arg0: i32) -> (i32, i32) {
    %c0_i32 = arith.constant 0 : i32
    %c0_i32_0 = arith.constant 0 : i32
    %c0_i32_1 = arith.constant 0 : i32
    return %c0_i32, %c0_i32_0 : i32, i32
  }
  func.func @transform_7(%arg0: i32) -> (i32, i32) {
    %c0_i32 = arith.constant 0 : i32
    %c0_i32_0 = arith.constant 0 : i32
    %c0_i32_1 = arith.constant 0 : i32
    return %c0_i32, %c0_i32_0 : i32, i32
  }
  func.func @transform_8(%arg0: i32) -> (i32, i32) {
    %c0_i32 = arith.constant 0 : i32
    %c0_i32_0 = arith.constant 0 : i32
    %c0_i32_1 = arith.constant 0 : i32
    return %c0_i32, %c0_i32_0 : i32, i32
  }
  func.func @transform_9(%arg0: i32) -> (i32, i32) {
    %c0_i32 = arith.constant 0 : i32
    %c0_i32_0 = arith.constant 0 : i32
    %c0_i32_1 = arith.constant 0 : i32
    return %c0_i32, %c0_i32_0 : i32, i32
  }
  func.func @transform_10(%arg0: i32) -> (i32, i32) {
    %c0_i32 = arith.constant 0 : i32
    %c0_i32_0 = arith.constant 0 : i32
    return %arg0, %c0_i32 : i32, i32
  }
}

</mosaic_0001>

<bundles_post_ra>
// kernel: netg_forward.1
= control target key start
LH: loop header
LB: loop body
LE: loop exit
PB: predicated region body
PF: predicated region fallthrough
CT: control target
= control target key end

     0   :  { %s1262_s13 = smov 0   ;;  %s1414_s0 = inlined_call_operand.vmem [shape: f32[64,16], index: 0, kind: input, shape index: {}]   ;;  %s1415_s1 = inlined_call_operand.vmem [shape: f32[64,16], index: 1, kind: input, shape index: {}]   ;;  %s1416_s2 = inlined_call_operand.vmem [shape: f32[64,16], index: 2, kind: input, shape index: {}]   ;;  %s1417_s3 = inlined_call_operand.vmem [shape: bf16[16,256], index: 3, kind: input, shape index: {}]   ;;  %s1418_s4 = inlined_call_operand.vmem [shape: bf16[16,256], index: 4, kind: input, shape index: {}]   ;;  %s1419_s5 = inlined_call_operand.vmem [shape: f32[1,256], index: 5, kind: input, shape index: {}]   ;;  %s1420_s6 = inlined_call_operand.vmem [shape: bf16[256,128], index: 6, kind: input, shape index: {}]   ;;  %s1421_s7 = inlined_call_operand.vmem [shape: f32[1,128], index: 7, kind: input, shape index: {}]   ;;  %s1422_s8 = inlined_call_operand.vmem [shape: bf16[128,16], index: 8, kind: input, shape index: {}]   ;;  %s1423_s9 = inlined_call_operand.vmem [shape: f32[1,16], index: 9, kind: input, shape index: {}]   ;;  %s1424_s10 = inlined_call_operand.vmem [shape: f32[64,16], index: 10, kind: output, shape index: {}]  }
   0x1 LB: > { %s998_s14 = sadd.s32 4294967295, %s1205_s13   ;;  %p1002_p0 = scmp.ge.s32.totalorder %s1205_s13, 1  ;;  %s1205_s13 = sphi %s1262_s13, %s20_s13  }
   0x2   : > { %p335_p1 = scmp.lt.s32.totalorder %s1205_s13, 3 }
   0x4   : > { %p336_p2 = pnand %p1002_p0, %p335_p1 }
   0x5   : > { %s1003_s27 = sshll.u32 (!%p336_p2), %s998_s14, 2 }
   0x6   : > { %339 = sbr.rel (%p336_p2) target bundleno = 509 (0x1fd), region = 60  ;;  %p384_p3 = scmp.lt.s32.totalorder (!%p336_p2), %s1003_s27, 7 }
   0xb   : > { %v1013_v0 = vld [vmem:[%s1418_s4] sm:$0xf]  ;;  %v1140_v1 = vld [vmem:[%s1418_s4 + $0x4] sm:$0xf0]  ;;  %v1137_v5 = vld [vmem:[%s1417_s3 + $0x4] sm:$0xf] }
   0xc   : > { %v1025_v2 = vld [vmem:[%s1417_s3] sm:$0xf]  ;;  %v1014_v3 = vor.u32 %v1140_v1, %v1013_v0  ;;  %v1138_v4 = vld [vmem:[%s1417_s3 + $0x4] sm:$0xf0]  ;;  %v1027_v6 = vld [vmem:[%s1417_s3 + $0x8] sm:$0xf0] }
   0xd   : > { %v1026_v7 = vor.u32 %v1138_v4, %v1025_v2  ;;  %v1030_v8 = vor.u32 %v1137_v5, %v1027_v6  ;;  %v1139_v9 = vld [vmem:[%s1418_s4 + $0x4] sm:$0xf]  ;;  %v1015_v10 = vld [vmem:[%s1418_s4 + $0x8] sm:$0xf0]  ;;  %v1148_v12 = vld [vmem:[%s1420_s6 + $0x38] sm:$0xff]  ;;  %s1426_s27 = smov (!%p384_p3, %s1003_s27), 7 }
   0xe   : > { %464 = vmatpush.bf16.msra.mxu0 %v1014_v3  ;;  %v1018_v11 = vor.u32 %v1139_v9, %v1015_v10  ;;  %v1156_v13 = vld [vmem:[%s1420_s6 + $0x78] sm:$0xff]  ;;  %v1147_v14 = vld [vmem:[%s1420_s6 + $0x30] sm:$0xff]  ;;  %s1306_s21 = sshll.u32 %s1426_s27, 3  ;;  %vm450_vm0 = vcmask 130048   ;;  %v1146_v44 = vld [vmem:[%s1420_s6 + $0x28] sm:$0xff] }
   0xf   : > { %518 = vmatpush.bf16.msra.mxu2 %v1026_v7  ;;  %537 = vmatpush.bf16.msra.mxu3 %v1030_v8  ;;  %v1155_v15 = vld [vmem:[%s1420_s6 + $0x70] sm:$0xff]  ;;  %s387_s24 = scalar_lea.vmem %s1414_s0, %s1306_s21  ;;  %s393_s28 = scalar_lea.vmem %s1415_s1, %s1306_s21  ;;  %v1154_v45 = vld [vmem:[%s1420_s6 + $0x68] sm:$0xff]  ;;  %v1145_v46 = vld [vmem:[%s1420_s6 + $0x20] sm:$0xff] }
  0x10   : > { %483 = vmatpush.bf16.msra.mxu1 %v1018_v11  ;;  %s399_s11 = scalar_lea.vmem %s1416_s2, %s1306_s21  ;;  %v408_v16 = vld [vmem:[%s387_s24] sm:$0xff]  ;;  %v409_v17 = vld [vmem:[%s387_s24 + $0x8] sm:$0xff]  ;;  %v410_v29 = vld [vmem:[%s387_s24 + $0x10] sm:$0xff]  ;;  %s1401_s25 = scalar_lea.vmem %s1424_s10, %s1306_s21 }
  0x11   : > { %v412_v18 = vld [vmem:[%s393_s28] sm:$0xff]  ;;  %v413_v19 = vld [vmem:[%s393_s28 + $0x8] sm:$0xff]  ;;  %v411_v30 = vld [vmem:[%s387_s24 + $0x18] sm:$0xff] }
  0x12   : > { %707 = vmatpush.bf16.msrb.mxu0 %v1148_v12  ;;  %v416_v20 = vld [vmem:[%s399_s11] sm:$0xff]  ;;  %v417_v21 = vld [vmem:[%s399_s11 + $0x8] sm:$0xff]  ;;  %v420_v22 = vsub.f32 %v408_v16, %v412_v18  ;;  %v421_v23 = vsub.f32 %v409_v17, %v413_v19  ;;  %v414_v31 = vld [vmem:[%s393_s28 + $0x10] sm:$0xff] }
  0x13   : > { %1165 = vmatpush.bf16.msrb.mxu3 %v1148_v12  ;;  %v436_v24 = vpack.c.bf16 %v417_v21, %v416_v20  ;;  %v415_v32 = vld [vmem:[%s393_s28 + $0x18] sm:$0xff]  ;;  %v422_v34 = vsub.f32 %v410_v29, %v414_v31  ;;  %v418_v36 = vld [vmem:[%s399_s11 + $0x10] sm:$0xff]  ;;  %v1153_v47 = vld [vmem:[%s1420_s6 + $0x60] sm:$0xff] }
  0x14   : > { %726 = vmatpush.bf16.msrb.mxu1 %v1156_v13  ;;  %v424_v25 = vmul.f32 %v420_v22, %v416_v20  ;;  %v425_v26 = vmul.f32 %v421_v23, %v417_v21  ;;  %v423_v35 = vsub.f32 %v411_v30, %v415_v32  ;;  %v419_v37 = vld [vmem:[%s399_s11 + $0x18] sm:$0xff]  ;;  %v1143_v50 = vld [vmem:[%s1420_s6 + $0x10] sm:$0xff]  ;;  %v1142_v52 = vld [vmem:[%s1420_s6 + $0x8] sm:$0xff] }
  0x15   : > { %1019 = vmatmul.msk.bf16.vlgmr.msra.gmra.mxu0 %vm450_vm0, %v436_v24  ;;  %1021 = vmatmul.msk.bf16.vlgmr.msra.gmra.mxu1 %vm450_vm0, %v436_v24  ;;  %v426_v38 = vmul.f32 %v422_v34, %v418_v36  ;;  %v437_v40 = vpack.c.bf16 %v419_v37, %v418_v36  ;;  %v1144_v48 = vld [vmem:[%s1420_s6 + $0x18] sm:$0xff]  ;;  %v1151_v51 = vld [vmem:[%s1420_s6 + $0x50] sm:$0xff]  ;;  %v1150_v53 = vld [vmem:[%s1420_s6 + $0x48] sm:$0xff] }
  0x16   : > { %708 = vmatpush.bf16.msrb.mxu0 %v1147_v14  ;;  %v428_v27 = vadd.f32 %v424_v25, %v412_v18  ;;  %v429_v28 = vadd.f32 %v425_v26, %v413_v19  ;;  %v427_v39 = vmul.f32 %v423_v35, %v419_v37  ;;  %v1152_v49 = vld [vmem:[%s1420_s6 + $0x58] sm:$0xff]  ;;  %v1141_v54 = vld [vmem:[%s1420_s6] sm:$0xff]  ;;  %v1163_v2 = vld [vmem:[%s1422_s8 + $0x30] sm:$0xff] }
  0x17   : > { %1166 = vmatpush.bf16.msrb.mxu3 %v1147_v14  ;;  %v430_v41 = vadd.f32 %v426_v38, %v414_v31  ;;  %v1149_v55 = vld [vmem:[%s1420_s6 + $0x40] sm:$0xff]  ;;  %v1164_v60 = vld [vmem:[%s1422_s8 + $0x38] sm:$0xff]  ;;  %v1162_v6 = vld [vmem:[%s1422_s8 + $0x28] sm:$0xff] }
  0x18   : > { %727 = vmatpush.bf16.msrb.mxu1 %v1155_v15  ;;  %v432_v33 = vpack.c.bf16 %v429_v28, %v428_v27  ;;  %v431_v42 = vadd.f32 %v427_v39, %v415_v32  ;;  %v549_v61 = vld [vmem:[%s1419_s5] sm:$0x3]  ;;  %819 = vmatpush.bf16.msrb.mxu2 %v1164_v60 }
  0x19   : > { %v552_v1 = vperm.slane %v549_v61, 1  ;;  %v551_v4 = vperm.slane %v549_v61, 0  ;;  %v1161_v15 = vld [vmem:[%s1422_s8 + $0x20] sm:$0xff] }
  0x1a   : > { %1031 = vmatmul.msk.bf16.vlgmr.msra.gmra.mxu2 %vm450_vm0, %v432_v33  ;;  %1033 = vmatmul.msk.bf16.vlgmr.msra.gmra.mxu3 %vm450_vm0, %v432_v33  ;;  %v433_v43 = vpack.c.bf16 %v431_v42, %v430_v41 }
  0x1b   : > { %709 = vmatpush.bf16.msrb.mxu0 %v1146_v44  ;;  %1167 = vmatpush.bf16.msrb.mxu3 %v1146_v44  ;;  %v1159_v44 = vld [vmem:[%s1422_s8 + $0x10] sm:$0xff] }
  0x1c   : > { %728 = vmatpush.bf16.msrb.mxu1 %v1154_v45  ;;  %820 = vmatpush.bf16.msrb.mxu2 %v1163_v2  ;;  %v1158_v45 = vld [vmem:[%s1422_s8 + $0x8] sm:$0xff] }
  0x1f   : > { %710 = vmatpush.bf16.msrb.mxu0 %v1145_v46  ;;  %1168 = vmatpush.bf16.msrb.mxu3 %v1145_v46  ;;  %v1157_v46 = vld [vmem:[%s1422_s8] sm:$0xff] }
  0x20   : > { %729 = vmatpush.bf16.msrb.mxu1 %v1153_v47  ;;  %821 = vmatpush.bf16.msrb.mxu2 %v1162_v6  ;;  %v1182_v6 = vld [vmem:[%s1423_s9] ss:$0 sm:$0xff] }
  0x23   : > { %711 = vmatpush.bf16.msrb.mxu0 %v1144_v48  ;;  %1169 = vmatpush.bf16.msrb.mxu3 %v1144_v48 }
  0x24   : > { %730 = vmatpush.bf16.msrb.mxu1 %v1152_v49  ;;  %822 = vmatpush.bf16.msrb.mxu2 %v1161_v15  ;;  %v1181_v49 = vld [vmem:[%s1421_s7] ss:$0 sm:$0xff] }
  0x25   : > { %1020 = vmatmul.msk.bf16.gmra.mxu0 %vm450_vm0, %v437_v40  ;;  %1022 = vmatmul.msk.bf16.gmra.mxu1 %vm450_vm0, %v437_v40 }
  0x27   : > { %712 = vmatpush.bf16.msrb.mxu0 %v1143_v50  ;;  %1170 = vmatpush.bf16.msrb.mxu3 %v1143_v50 }
  0x28   : > { %731 = vmatpush.bf16.msrb.mxu1 %v1151_v51 }
  0x2a   : > { %1032 = vmatmul.msk.bf16.gmra.mxu2 %vm450_vm0, %v433_v43  ;;  %1034 = vmatmul.msk.bf16.gmra.mxu3 %vm450_vm0, %v433_v43  ;;  %v1160_v43 = vld [vmem:[%s1422_s8 + $0x18] sm:$0xff] }
  0x2b   : > { %713 = vmatpush.bf16.msrb.mxu0 %v1142_v52  ;;  %1171 = vmatpush.bf16.msrb.mxu3 %v1142_v52 }
  0x2c   : > { %732 = vmatpush.bf16.msrb.mxu1 %v1150_v53  ;;  %823 = vmatpush.bf16.msrb.mxu2 %v1160_v43 }
  0x2f   : > { %714 = vmatpush.bf16.msrb.mxu0 %v1141_v54  ;;  %1172 = vmatpush.bf16.msrb.mxu3 %v1141_v54 }
  0x30   : > { %733 = vmatpush.bf16.msrb.mxu1 %v1149_v55  ;;  %824 = vmatpush.bf16.msrb.mxu2 %v1159_v44 }
  0x34   : > { %825 = vmatpush.bf16.msrb.mxu2 %v1158_v45 }
  0x38   : > { %826 = vmatpush.bf16.msrb.mxu2 %v1157_v46 }
  0x92   : > { %v485_v56 = vpop.f32.mrf.mxu1  ;;  %v466_v57 = vpop.f32.mrf.mxu0 }
  0x9a   : > { %v487_v62 = vpop.f32.mrf.mxu1  ;;  %v468_v63 = vpop.f32.mrf.mxu0 }
  0x9d   : > { %v520_v58 = vpop.f32.mrf.mxu2  ;;  %v539_v59 = vpop.f32.mrf.mxu3 }
  0x9e   : > { %v540_v0 = vadd.f32 %v539_v59, %v485_v56  ;;  %v521_v3 = vadd.f32 %v520_v58, %v466_v57 }
  0xa0   : > { %v556_v5 = vadd.f32 %v552_v1, %v540_v0  ;;  %v555_v9 = vadd.f32 %v551_v4, %v521_v3 }
  0xa2   : > { %v564_v12 = vmax.f32 %v556_v5, 0.0  ;;  %v490_v16 = vpop.f32.mrf.mxu1  ;;  %v563_v17 = vmax.f32 %v555_v9, 0.0  ;;  %v471_v18 = vpop.f32.mrf.mxu0 }
  0xa5   : > { %v522_v7 = vpop.f32.mrf.mxu2  ;;  %v541_v8 = vpop.f32.mrf.mxu3 }
  0xa6   : > { %v523_v10 = vadd.f32 %v522_v7, %v468_v63  ;;  %v542_v11 = vadd.f32 %v541_v8, %v487_v62 }
  0xa8   : > { %v557_v13 = vadd.f32 %v551_v4, %v523_v10  ;;  %v558_v14 = vadd.f32 %v552_v1, %v542_v11 }
  0xaa   : > { %v565_v19 = vmax.f32 %v557_v13, 0.0  ;;  %v566_v20 = vmax.f32 %v558_v14, 0.0  ;;  %v492_v27 = vpop.f32.mrf.mxu1  ;;  %v473_v28 = vpop.f32.mrf.mxu0 }
  0xac   : > { %v571_v21 = vpack.c.bf16 %v565_v19, %v563_v17  ;;  %v572_v22 = vpack.c.bf16 %v566_v20, %v564_v12 }
  0xad   : > { %v525_v23 = vpop.f32.mrf.mxu2  ;;  %v544_v24 = vpop.f32.mrf.mxu3 }
  0xae   : > { %715 = vmatmul.bf16.vlgmr.msrb.gmra.mxu0 %v571_v21  ;;  %734 = vmatmul.bf16.vlgmr.msrb.gmra.mxu1 %v572_v22  ;;  %v545_v25 = vadd.f32 %v544_v24, %v490_v16  ;;  %v526_v26 = vadd.f32 %v525_v23, %v471_v18 }
  0xb0   : > { %v560_v29 = vadd.f32 %v552_v1, %v545_v25  ;;  %v559_v32 = vadd.f32 %v551_v4, %v526_v26 }
  0xb2   : > { %v568_v35 = vmax.f32 %v560_v29, 0.0  ;;  %v567_v38 = vmax.f32 %v559_v32, 0.0 }
  0xb5   : > { %v527_v30 = vpop.f32.mrf.mxu2  ;;  %v546_v31 = vpop.f32.mrf.mxu3 }
  0xb6   : > { %v528_v33 = vadd.f32 %v527_v30, %v473_v28  ;;  %v547_v34 = vadd.f32 %v546_v31, %v492_v27 }
  0xb8   : > { %v561_v36 = vadd.f32 %v551_v4, %v528_v33  ;;  %v562_v37 = vadd.f32 %v552_v1, %v547_v34 }
  0xba   : > { %v569_v39 = vmax.f32 %v561_v36, 0.0  ;;  %v570_v40 = vmax.f32 %v562_v37, 0.0 }
  0xbc   : > { %v573_v41 = vpack.c.bf16 %v569_v39, %v567_v38  ;;  %v574_v42 = vpack.c.bf16 %v570_v40, %v568_v35 }
  0xbe   : > { %720 = vmatmul.bf16.vlgmr.msrb.gmra.mxu3 %v573_v41  ;;  %739 = vmatmul.bf16.gmra.mxu1 %v574_v42 }
 0x12b   : > { %v716_v47 = vpop.f32.mrf.mxu0  ;;  %v735_v48 = vpop.f32.mrf.mxu1 }
 0x12c   : > { %v717_v50 = vadd.f32 %v1181_v49, %v716_v47 }
 0x12e   : > { %v736_v52 = vadd.f32 %v735_v48, %v717_v50 }
 0x130   : > { %v745_v56 = vmax.f32 %v736_v52, 0.0 }
 0x133   : > { %v718_v51 = vpop.f32.mrf.mxu0  ;;  %v737_v54 = vpop.f32.mrf.mxu1 }
 0x134   : > { %v719_v53 = vadd.f32 %v1181_v49, %v718_v51 }
 0x136   : > { %v738_v55 = vadd.f32 %v737_v54, %v719_v53 }
 0x138   : > { %v746_v57 = vmax.f32 %v738_v55, 0.0 }
 0x13a   : > { %v749_v58 = vpack.c.bf16 %v746_v57, %v745_v56 }
 0x13b   : > { %v740_v59 = vpop.f32.mrf.mxu1 }
 0x13c   : > { %827 = vmatmul.bf16.vlgmr.msrb.gmra.mxu2 %v749_v58 }
 0x141   : > { %v721_v60 = vpop.f32.mrf.mxu3 }
 0x142   : > { %v722_v61 = vadd.f32 %v1181_v49, %v721_v60 }
 0x143   : > { %v742_v1 = vpop.f32.mrf.mxu1 }
 0x144   : > { %v741_v63 = vadd.f32 %v740_v59, %v722_v61 }
 0x146   : > { %v747_v3 = vmax.f32 %v741_v63, 0.0 }
 0x149   : > { %v723_v62 = vpop.f32.mrf.mxu3 }
 0x14a   : > { %v724_v0 = vadd.f32 %v1181_v49, %v723_v62 }
 0x14c   : > { %v743_v2 = vadd.f32 %v742_v1, %v724_v0 }
 0x14e   : > { %v748_v4 = vmax.f32 %v743_v2, 0.0 }
 0x150   : > { %v750_v5 = vpack.c.bf16 %v748_v4, %v747_v3 }
 0x152   : > { %832 = vmatmul.bf16.gmra.mxu2 %v750_v5 }
 0x1bf   : > { %v828_v7 = vpop.f32.mrf.mxu2 }
 0x1c0   : > { %v829_v8 = vadd.f32 %v1182_v6, %v828_v7 }
 0x1c2   : > { %v1131_v9 = vmul.f32 -1.442695, %v829_v8 }
 0x1c4   : > { %1183 = vpow2.f32 %v1131_v9 }
 0x1c7   : > { %v830_v10 = vpop.f32.mrf.mxu2 }
 0x1c8   : > { %v831_v11 = vadd.f32 %v1182_v6, %v830_v10 }
 0x1ca   : > { %v1184_v12 = vpop.eup %1183  ;;  %v1132_v13 = vmul.f32 -1.442695, %v831_v11 }
 0x1cb   : > { %v850_v14 = vadd.f32 1.0, %v1184_v12 }
 0x1cc   : > { %1185 = vpow2.f32 %v1132_v13 }
 0x1cd   : > { %1187 = vrcp.f32 %v850_v14  ;;  %v865_v22 = vand.u32 2147483648, %v850_v14  ;;  %v863_v24 = vand.u32 2147483647, %v850_v14  ;;  %vm859_vm2 = vweird.f32 %v850_v14 }
 0x1cf   : > { %v866_v28 = vor.u32 1.1754944e-38, %v865_v22  ;;  %vm864_vm4 = vcmp.eq.f32.partialorder %v863_v24, 8.507059e+37 }
 0x1d2   : > { %v1186_v15 = vpop.eup %1185 }
 0x1d3   : > { %v1188_v16 = vpop.eup %1187  ;;  %v851_v17 = vadd.f32 1.0, %v1186_v15 }
 0x1d4   : > { %v855_v18 = vmul.f32 %v1188_v16, %v850_v14  ;;  %vm860_vm1 = vweird.f32 %v1188_v16 }
 0x1d5   : > { %1189 = vrcp.f32 %v851_v17  ;;  %v833_v19 = vpop.f32.mrf.mxu2  ;;  %vm861_vm3 = vmor %vm859_vm2, %vm860_vm1  ;;  %v880_v35 = vand.u32 2147483648, %v851_v17  ;;  %v878_v38 = vand.u32 2147483647, %v851_v17  ;;  %vm874_vm6 = vweird.f32 %v851_v17 }
 0x1d6   : > { %v856_v20 = vsub.f32 1.0, %v855_v18  ;;  %v834_v21 = vadd.f32 %v1182_v6, %v833_v19 }
 0x1d7   : > { %v881_v42 = vor.u32 1.1754944e-38, %v880_v35  ;;  %vm879_vm8 = vcmp.eq.f32.partialorder %v878_v38, 8.507059e+37 }
 0x1d8   : > { %v857_v23 = vmul.f32 %v1188_v16, %v856_v20  ;;  %v1133_v25 = vmul.f32 -1.442695, %v834_v21 }
 0x1da   : > { %v858_v26 = vadd.f32 %v1188_v16, %v857_v23  ;;  %1191 = vpow2.f32 %v1133_v25 }
 0x1db   : > { %v1190_v27 = vpop.eup %1189 }
 0x1dc   : > { %v862_v29 = vsel %vm861_vm3, %v1188_v16, %v858_v26  ;;  %v870_v30 = vmul.f32 %v1190_v27, %v851_v17  ;;  %vm875_vm5 = vweird.f32 %v1190_v27 }
 0x1dd   : > { %v867_v31 = vsel %vm864_vm4, %v866_v28, %v862_v29  ;;  %v835_v32 = vpop.f32.mrf.mxu2  ;;  %vm876_vm7 = vmor %vm874_vm6, %vm875_vm5 }
 0x1de   : > { %914 = vst.msk [vmem:[%s1401_s25] sm:$0xff] %vm450_vm0, %v867_v31  ;;  %v871_v33 = vsub.f32 1.0, %v870_v30  ;;  %v836_v34 = vadd.f32 %v1182_v6, %v835_v32 }
 0x1e0   : > { %v1192_v36 = vpop.eup %1191  ;;  %v872_v37 = vmul.f32 %v1190_v27, %v871_v33  ;;  %v1134_v39 = vmul.f32 -1.442695, %v836_v34 }
 0x1e1   : > { %v852_v40 = vadd.f32 1.0, %v1192_v36 }
 0x1e2   : > { %v873_v41 = vadd.f32 %v1190_v27, %v872_v37  ;;  %1193 = vpow2.f32 %v1134_v39 }
 0x1e3   : > { %1195 = vrcp.f32 %v852_v40  ;;  %v895_v50 = vand.u32 2147483648, %v852_v40  ;;  %v893_v52 = vand.u32 2147483647, %v852_v40  ;;  %vm889_vm10 = vweird.f32 %v852_v40 }
 0x1e4   : > { %v877_v43 = vsel %vm876_vm7, %v1190_v27, %v873_v41 }
 0x1e5   : > { %v882_v44 = vsel %vm879_vm8, %v881_v42, %v877_v43  ;;  %v896_v55 = vor.u32 1.1754944e-38, %v895_v50  ;;  %vm894_vm12 = vcmp.eq.f32.partialorder %v893_v52, 8.507059e+37 }
 0x1e6   : > { %915 = vst.msk [vmem:[%s1401_s25 + $0x8] sm:$0xff] %vm450_vm0, %v882_v44 }
 0x1e8   : > { %v1194_v45 = vpop.eup %1193 }
 0x1e9   : > { %v1196_v46 = vpop.eup %1195  ;;  %v853_v47 = vadd.f32 1.0, %v1194_v45 }
 0x1ea   : > { %v885_v48 = vmul.f32 %v1196_v46, %v852_v40  ;;  %vm890_vm9 = vweird.f32 %v1196_v46 }
 0x1eb   : > { %1197 = vrcp.f32 %v853_v47  ;;  %vm891_vm11 = vmor %vm889_vm10, %vm890_vm9  ;;  %v910_v60 = vand.u32 2147483648, %v853_v47  ;;  %v908_v62 = vand.u32 2147483647, %v853_v47  ;;  %vm904_vm14 = vweird.f32 %v853_v47 }
 0x1ec   : > { %v886_v49 = vsub.f32 1.0, %v885_v48 }
 0x1ed   : > { %v911_v0 = vor.u32 1.1754944e-38, %v910_v60  ;;  %vm909_vm1 = vcmp.eq.f32.partialorder %v908_v62, 8.507059e+37 }
 0x1ee   : > { %v887_v51 = vmul.f32 %v1196_v46, %v886_v49 }
 0x1f0   : > { %v888_v53 = vadd.f32 %v1196_v46, %v887_v51 }
 0x1f1   : > { %v1198_v54 = vpop.eup %1197 }
 0x1f2   : > { %v892_v56 = vsel %vm891_vm11, %v1196_v46, %v888_v53  ;;  %v900_v57 = vmul.f32 %v1198_v54, %v853_v47  ;;  %vm905_vm13 = vweird.f32 %v1198_v54 }
 0x1f3   : > { %v897_v58 = vsel %vm894_vm12, %v896_v55, %v892_v56  ;;  %vm906_vm15 = vmor %vm904_vm14, %vm905_vm13 }
 0x1f4   : > { %916 = vst.msk [vmem:[%s1401_s25 + $0x10] sm:$0xff] %vm450_vm0, %v897_v58  ;;  %v901_v59 = vsub.f32 1.0, %v900_v57 }
 0x1f6   : > { %v902_v61 = vmul.f32 %v1198_v54, %v901_v59 }
 0x1f8   : > { %v903_v63 = vadd.f32 %v1198_v54, %v902_v61 }
 0x1fa   : > { %v907_v1 = vsel %vm906_vm15, %v1198_v54, %v903_v63 }
 0x1fb   : > { %v912_v2 = vsel %vm909_vm1, %v911_v0, %v907_v1 }
 0x1fc   : > { %917 = vst.msk [vmem:[%s1401_s25 + $0x18] sm:$0xff] %vm450_vm0, %v912_v2 }
 0x1fd PF: > { %s20_s13 = sadd.s32 1, %s1205_s13  }
 0x1fe   : > { %p17_p4 = scmp.ge.s32.totalorder %s20_s13, 4  }
 0x200   :  { %19 = sbr.rel (!%p17_p4) target bundleno = 1 (0x1), region = 96 }

</bundles_post_ra>
